<compile_context>
chip_gen: v6e
topology: v6e:2x2x1
jax: 0.10.0
libtpu: 0.0.40
codegen_flags: <defaults>
</compile_context>

<pallas_src>
import functools

import jax
import jax.numpy as jnp
from jax.experimental import pallas as pl
from jax.experimental.pallas import tpu as pltpu


def _round_up(x, m):
    return ((x + m - 1) // m) * m


def _vmem_limit(nbytes):
    # Explicit scoped-VMEM request; floor at the v6e default, cap so the request stays
    # plausible on v7x's 64 MiB per TensorCore.
    return int(min(64 << 20, max(32 << 20, int(nbytes))))


# --------------------------------------------------------------------------- #
# Kernel 1: fused per-node projection  proj = h @ [Wz | Wsrc | Wdst]
#   one MXU matmul per row tile, one full-width (lane-dense) store per step.
# --------------------------------------------------------------------------- #
def _projection_kernel(h_ref, p_ref, o_ref):
    o_ref[...] = jnp.dot(
        h_ref[...], p_ref[...], preferred_element_type=jnp.float32
    ).astype(o_ref.dtype)


# --------------------------------------------------------------------------- #
# Kernel 2: masked edge-softmax + weighted aggregation for one tile of dst rows.
# --------------------------------------------------------------------------- #
def _attention_kernel(z_ref, es_ref, ed_ref, adj_ref, o_ref, *, n_heads, mxu_dtype):
    mask = adj_ref[...] != 0                                   # [tm, N_src] bool
    # Per-row "has >= 1 in-edge" indicator (shared across heads).  A fully masked row
    # would otherwise softmax to uniform weights; this forces exact zeros for
    # zero-degree dst rows (including the n_dst padding rows).
    has_edge = jnp.max(mask.astype(jnp.float32), axis=1, keepdims=True)

    ed = ed_ref[...]                                           # [tm, H]    f32
    es = es_ref[...]                                           # [H, N_src] f32

    head_outs = []
    for head in range(n_heads):
        # e[i, j] = leaky_relu(a_src . z_j + a_dst . z_i)   (projections pre-folded)
        e = ed[:, head:head + 1] + es[head:head + 1, :]        # [tm, N_src]
        e = jnp.where(e > 0, e, 0.01 * e)                      # F.leaky_relu (slope 0.01)
        e = jnp.where(mask, e, -1e30)                          # mask non-edges

        # masked softmax over incoming edges (all f32).  exp(-1e30 - m) underflows to
        # exactly 0 for masked lanes, so no post-exp select is needed.
        m = jnp.max(e, axis=1, keepdims=True)
        p = jnp.exp(e - m)
        denom = jnp.sum(p, axis=1, keepdims=True)
        inv = pl.reciprocal(jnp.maximum(denom, 1e-30), approx=False) * has_edge

        # h_dst = (sum_j p[i,j] * z_j) * (1/denom[i]); z is head-major, so z_ref[head]
        # is a whole block (no lane slicing / relayout inside the hot loop).
        acc = jnp.dot(p.astype(mxu_dtype), z_ref[head],
                      preferred_element_type=jnp.float32)      # [tm, out_dim]
        head_outs.append(acc * inv)

    # single lane-dense store, directly in the 'cat' layout
    o_ref[...] = jnp.concatenate(head_outs, axis=1).astype(o_ref.dtype)


def multi_head_gat(h, adj, W, A, merge="cat", mxu_dtype=jnp.bfloat16):
    n_heads, out_dim, in_dim = W.shape
    n_src = h.shape[0]
    n_dst = adj.shape[0]
    dz = n_heads * out_dim
    n_cols = dz + 2 * n_heads
    itemsize = jnp.dtype(mxu_dtype).itemsize

    # ---- parameter folding (tiny one-time ops outside the hot path) ----
    a_src = A[:, 0, :out_dim]                                   # [H, out_dim]
    a_dst = A[:, 0, out_dim:]                                   # [H, out_dim]
    p_z = jnp.transpose(W, (2, 0, 1)).reshape(in_dim, dz)       # h @ p_z == all heads' fc, concat
    w_src = jnp.einsum("hoi,ho->ih", W, a_src)                  # [in_dim, H]
    w_dst = jnp.einsum("hoi,ho->ih", W, a_dst)                  # [in_dim, H]
    proj_w = jnp.concatenate([p_z, w_src, w_dst], axis=1).astype(mxu_dtype)

    # ---- padding / tile choice ----
    if n_src <= 256:
        rt = _round_up(n_src, 8)
        n_src_pad = rt
    else:
        rt = 256
        n_src_pad = _round_up(n_src, rt)
    if n_dst <= 128:
        tm = _round_up(n_dst, 32)      # adj is int8: keep >= 32 sublanes per dst tile
        n_dst_pad = tm
    else:
        tm = 128                       # cap at 128 (v7x VMEM budget)
        n_dst_pad = _round_up(n_dst, tm)

    h_pad = jnp.pad(h, ((0, n_src_pad - n_src), (0, 0))).astype(mxu_dtype)
    adj_i8 = adj if adj.dtype == jnp.int8 else (adj != 0).astype(jnp.int8)
    adj_pad = jnp.pad(adj_i8, ((0, n_dst_pad - n_dst), (0, n_src_pad - n_src)))

    # ---- kernel 1: row-tiled fused projection (parallel over src-row tiles) ----
    k1_cost = pl.CostEstimate(
        flops=2 * n_src_pad * in_dim * n_cols,
        transcendentals=0,
        bytes_accessed=(n_src_pad * in_dim * itemsize
                        + in_dim * n_cols * itemsize
                        + n_src_pad * n_cols * 4))
    k1_vmem = (2 * rt * in_dim * itemsize + in_dim * n_cols * itemsize
               + 2 * rt * n_cols * 4 + (1 << 20))
    slab = pl.pallas_call(
        _projection_kernel,
        out_shape=jax.ShapeDtypeStruct((n_src_pad, n_cols), jnp.float32),
        grid_spec=pltpu.PrefetchScalarGridSpec(
            num_scalar_prefetch=0,
            grid=(n_src_pad // rt,),
            in_specs=[
                pl.BlockSpec((rt, in_dim), lambda i: (i, 0)),
                pl.BlockSpec((in_dim, n_cols), lambda i: (0, 0)),
            ],
            out_specs=pl.BlockSpec((rt, n_cols), lambda i: (i, 0)),
        ),
        compiler_params=pltpu.CompilerParams(
            dimension_semantics=("parallel",),
            vmem_limit_bytes=_vmem_limit(k1_vmem)),
        cost_estimate=k1_cost,
    )(h_pad, proj_w)

    # ---- wrapper-side split of the projection slab (single fused XLA pass) ----
    z_heads = (slab[:, :dz].reshape(n_src_pad, n_heads, out_dim)
               .transpose(1, 0, 2).astype(mxu_dtype))           # [H, N_src, out_dim] head-major
    e_src_t = slab[:, dz:dz + n_heads].T                        # [H, N_src]  f32
    e_dst = slab[:n_dst, dz + n_heads:]                         # [N_dst, H]  f32
    e_dst = jnp.pad(e_dst, ((0, n_dst_pad - n_dst), (0, 0)))

    # ---- kernel 2: masked edge-softmax + aggregation, tiled over dst rows ----
    k2_cost = pl.CostEstimate(
        flops=(2 * n_heads * n_dst_pad * n_src_pad * out_dim
               + 8 * n_heads * n_dst_pad * n_src_pad),
        transcendentals=n_heads * n_dst_pad * n_src_pad,
        bytes_accessed=(z_heads.size * itemsize + e_src_t.size * 4
                        + adj_pad.size + e_dst.size * 4 + n_dst_pad * dz * 4))
    k2_vmem = (z_heads.size * itemsize + e_src_t.size * 4
               + 2 * (tm * n_src_pad + tm * n_heads * 4 + tm * dz * 4)
               + 6 * tm * n_src_pad * 4 + (1 << 20))
    out = pl.pallas_call(
        functools.partial(_attention_kernel, n_heads=n_heads, mxu_dtype=mxu_dtype),
        out_shape=jax.ShapeDtypeStruct((n_dst_pad, dz), jnp.float32),
        grid_spec=pltpu.PrefetchScalarGridSpec(
            num_scalar_prefetch=0,
            grid=(n_dst_pad // tm,),
            in_specs=[
                pl.BlockSpec((n_heads, n_src_pad, out_dim), lambda i: (0, 0, 0)),  # z (resident)
                pl.BlockSpec((n_heads, n_src_pad), lambda i: (0, 0)),              # e_src^T
                pl.BlockSpec((tm, n_heads), lambda i: (i, 0)),                     # e_dst tile
                pl.BlockSpec((tm, n_src_pad), lambda i: (i, 0)),                   # adj tile (int8)
            ],
            out_specs=pl.BlockSpec((tm, dz), lambda i: (i, 0)),                    # 'cat' layout
        ),
        compiler_params=pltpu.CompilerParams(
            dimension_semantics=("parallel",),
            vmem_limit_bytes=_vmem_limit(k2_vmem)),
        cost_estimate=k2_cost,
    )(z_heads, e_src_t, e_dst, adj_pad)

    out = out[:n_dst]
    if merge == "cat":
        return out                      # [N_dst, H*out_dim] == torch.cat(head_outs, dim=1)
    return jnp.mean(out)                # torch.mean(torch.stack(head_outs)) -> scalar


def _xavier_normal(key, shape, gain):
    fan_out, fan_in = shape[-2], shape[-1]
    std = gain * jnp.sqrt(2.0 / (fan_in + fan_out))
    return std * jax.random.normal(key, shape, dtype=jnp.float32)


def _reference(h, adj, W, A):
    """Pure-JAX f32 reference of the same dense-masked GAT, per head + concat."""
    outs = []
    out_dim = W.shape[1]
    n_dst = adj.shape[0]
    mask = adj != 0
    for hh in range(W.shape[0]):
        z = h @ W[hh].T
        a = A[hh][0]
        e = (z @ a[:out_dim])[None, :] + (z[:n_dst] @ a[out_dim:])[:, None]
        e = jnp.where(e > 0, e, 0.01 * e)
        e = jnp.where(mask, e, -1e30)
        p = jnp.exp(e - jnp.max(e, axis=1, keepdims=True))
        p = jnp.where(mask, p, 0.0)
        alpha = p / jnp.sum(p, axis=1, keepdims=True)
        outs.append(alpha @ z)
    return jnp.concatenate(outs, axis=1)


if __name__ == "__main__":
    # graph block: 16 src nodes, 8 dst nodes, in_dim=32, out_dim=16, 4 heads, merge='cat'
    N_SRC, N_DST, IN_DIM, OUT_DIM, NUM_HEADS = 16, 8, 32, 16, 4

    key = jax.random.PRNGKey(0)
    k_h, k_adj, k_w, k_a = jax.random.split(key, 4)

    h = jax.random.normal(k_h, (N_SRC, IN_DIM), dtype=jnp.float32)

    # random edges + guaranteed self-loop per dst node; stored as an int8 mask
    adj_b = jnp.logical_or(jax.random.uniform(k_adj, (N_DST, N_SRC)) < 0.4,
                           jnp.eye(N_DST, N_SRC, dtype=bool))
    adj = adj_b.astype(jnp.int8)

    # parameter init mirrors GATLayer.reset_parameters(): xavier_normal_ with relu gain
    gain = jnp.sqrt(2.0)
    W = _xavier_normal(k_w, (NUM_HEADS, OUT_DIM, IN_DIM), gain)     # fc.weight per head
    A = _xavier_normal(k_a, (NUM_HEADS, 1, 2 * OUT_DIM), gain)      # attn_fc.weight per head

    ref = _reference(h, adj, W, A)

    # f32 MXU path (exact reciprocal -> tight tolerance)
    out_f32 = jax.block_until_ready(
        multi_head_gat(h, adj, W, A, merge="cat", mxu_dtype=jnp.float32))
    assert out_f32.shape == (N_DST, NUM_HEADS * OUT_DIM)
    assert jnp.allclose(out_f32, ref, atol=2e-3, rtol=2e-3)

    # default bf16 MXU path (f32 accumulation / f32 softmax) -- looser sanity check
    out_bf16 = jax.block_until_ready(multi_head_gat(h, adj, W, A, merge="cat"))
    assert out_bf16.shape == (N_DST, NUM_HEADS * OUT_DIM)
    assert jnp.allclose(out_bf16, ref, atol=1e-1, rtol=1e-1)

    # merge='mean' path (scalar, mirrors torch.mean(torch.stack(head_outs)))
    out_mean = jax.block_until_ready(
        multi_head_gat(h, adj, W, A, merge="mean", mxu_dtype=jnp.float32))
    assert jnp.allclose(out_mean, jnp.mean(ref), atol=2e-3, rtol=2e-3)

    print("KERNEL_OK")
</pallas_src>

<mosaic_0001>
module attributes {stable_mosaic.version = 11 : i64} {
  func.func @_projection_kernel(%arg0: i32, %arg1: memref<16x32xf32, #tpu.memory_space<vmem>>, %arg2: memref<32x72xf32, #tpu.memory_space<vmem>>, %arg3: memref<16x72xf32, #tpu.memory_space<vmem>>) attributes {dimension_semantics = [#tpu.dimension_semantics<parallel>], iteration_bounds = array<i64: 1>, scalar_prefetch = 0 : i64, scratch_operands = 0 : i64, tpu.core_type = #tpu.core_type<tc>, window_params = [{transform_indices = @transform_0, window_bounds = array<i64: 16, 32>}, {pipeline_mode = #tpu.pipeline_mode<synchronous>, transform_indices = @transform_1, window_bounds = array<i64: 32, 72>}, {transform_indices = @transform_2, window_bounds = array<i64: 16, 72>}]} {
    %c0 = arith.constant 0 : index
    %c0_0 = arith.constant 0 : index
    %0 = vector.load %arg1[%c0, %c0_0] : memref<16x32xf32, #tpu.memory_space<vmem>>, vector<16x32xf32>
    %c0_1 = arith.constant 0 : index
    %c0_2 = arith.constant 0 : index
    %1 = vector.load %arg2[%c0_1, %c0_2] : memref<32x72xf32, #tpu.memory_space<vmem>>, vector<32x72xf32>
    %cst = arith.constant dense<0.000000e+00> : vector<16x72xf32>
    %2 = tpu.matmul %0, %1, %cst {dimension_numbers = #tpu.dot_dimension_numbers<[1], [0], [0], [1], [0, 0, 1, 1], [], []>} : vector<16x32xf32>, vector<32x72xf32>, vector<16x72xf32> -> vector<16x72xf32>
    %c0_3 = arith.constant 0 : index
    %c0_4 = arith.constant 0 : index
    %3 = vector.load %arg3[%c0_3, %c0_4] : memref<16x72xf32, #tpu.memory_space<vmem>>, vector<16x72xf32>
    tpu.vector_store %arg3[%c0_3, %c0_4], %2 {strides = array<i32>} : memref<16x72xf32, #tpu.memory_space<vmem>>, vector<16x72xf32>,
    return
  }
  func.func @transform_0(%arg0: i32) -> (i32, i32) {
    %c0_i32 = arith.constant 0 : i32
    %c0_i32_0 = arith.constant 0 : i32
    return %arg0, %c0_i32 : i32, i32
  }
  func.func @transform_1(%arg0: i32) -> (i32, i32) {
    %c0_i32 = arith.constant 0 : i32
    %c0_i32_0 = arith.constant 0 : i32
    %c0_i32_1 = arith.constant 0 : i32
    return %c0_i32, %c0_i32_0 : i32, i32
  }
  func.func @transform_2(%arg0: i32) -> (i32, i32) {
    %c0_i32 = arith.constant 0 : i32
    %c0_i32_0 = arith.constant 0 : i32
    return %arg0, %c0_i32 : i32, i32
  }
}

</mosaic_0001>

<bundles_post_ra>
// kernel: tpu_custom_call.1
= control target key start
LH: loop header
LB: loop body
LE: loop exit
PB: predicated region body
PF: predicated region fallthrough
CT: control target
= control target key end

     0   :  { %7 = vsyncpa [#allocation3], 0  ;;  %s279_s0 = inlined_call_operand.hbm [shape: f32[16,32], index: 0, kind: input, shape index: {}]   ;;  %s280_s1 = inlined_call_operand.hbm [shape: f32[32,72], index: 1, kind: input, shape index: {}]   ;;  %s281_s2 = inlined_call_operand.hbm [shape: f32[16,72], index: 2, kind: output, shape index: {}]  }
   0x1   :  { %8 = vsyncpa [#allocation6], 0 }
   0x2   :  { %9 = vsyncpa [#allocation4], 0  ;;  %s239_s9 = smov [#allocation2]  }
   0x3   :  { %s15_s10 = sshll.u32 %s239_s9, 4  ;;  %s16_s10 = int_to_ptr.vmem [resolvable:$true] %s15_s10 }
   0x4   :  { %s181_s11 = scalar_lea.vmem %s16_s10, 256  ;;  %p186_p1 = scmp.lt.s32.totalorder %s16_s10, %s16_s10 }
   0x5   :  { %p182_p0 = scmp.ne.s32.totalorder %s16_s10, %s181_s11  ;;  %p187_p2 = scmp.lt.s32.totalorder %s181_s11, %s181_s11 }
   0x7   :  { %p188_p3 = por %p187_p2, %p186_p1 }
   0x9   :  { %p189_p4 = pnand %p188_p3, %p182_p0 }
   0xb   :  { %192 = shalt.err (!%p189_p4)
}
   0xc   :  { %s240_s12 = smov 128   ;;  %s241_s13 = smov 8  }
   0xd   :  { %21 = dma.hbm_to_vmem [thread:$0]  %s279_s0, 256, %s16_s10, [#allocation3], %s240_s12, %s240_s12, %s241_s13  }
   0xe   :  { %s242_s16 = smov [#allocation5]  }
   0xf   :  { %s27_s17 = sshll.u32 %s242_s16, 4  ;;  %s28_s17 = int_to_ptr.vmem [resolvable:$true] %s27_s17 }
  0x10   :  { %s201_s18 = scalar_lea.vmem %s28_s17, 512  ;;  %p206_p6 = scmp.lt.s32.totalorder %s28_s17, %s28_s17 }
  0x11   :  { %p202_p5 = scmp.ne.s32.totalorder %s28_s17, %s201_s18  ;;  %p207_p7 = scmp.lt.s32.totalorder %s201_s18, %s201_s18 }
  0x13   :  { %p208_p8 = por %p207_p7, %p206_p6 }
  0x15   :  { %p209_p9 = pnand %p208_p8, %p202_p5 }
  0x17   :  { %212 = shalt.err (!%p209_p9)
}
  0x18   :  { %33 = dma.hbm_to_vmem [thread:$0]  %s280_s1, 512, %s28_s17, [#allocation6], %s240_s12, %s240_s12, %s241_s13  }
  0x19   :  { %233 = dma.done.wait [#allocation3], 256  }
  0x1a   :  { %234 = vsyncadd [#allocation3], 4294967040 }
  0x1b   :  { %235 = dma.done.wait [#allocation6], 512  }
  0x1c   :  { %236 = vsyncadd [#allocation6], 4294966784  ;;  %vm46_vm0 = vcmask 261120   ;;  %v45_v0 = vld [vmem:[#allocation5 + $0x18] sm:$0xff]  ;;  %v44_v1 = vld [vmem:[#allocation5 + $0x10] sm:$0xff]  ;;  %vm128_vm1 = vcmask 588800  }
  0x1d   :  { %157 = vmatprep.subr.mxu0 %v45_v0  ;;  %v40_v2 = vld [vmem:[#allocation2] sm:$0xff]  ;;  %v43_v3 = vld [vmem:[#allocation5 + $0x8] sm:$0xff]  ;;  %v42_v4 = vld [vmem:[#allocation5] sm:$0xff]  ;;  %s243_s0 = smov [#allocation7]  }
  0x1e   :  { %158 = vmatpush3.msra.mxu0 %v45_v0  ;;  %165 = vmatprep.mubr.msk.f32.mxu0 %vm46_vm0, %v40_v2  ;;  %v41_v5 = vld [vmem:[#allocation2 + $0x8] sm:$0xff]  ;;  %s136_s1 = sshll.u32 %s243_s0, 4  ;;  %s137_s1 = int_to_ptr.vmem [resolvable:$true] %s136_s1 }
  0x1f   :  { %159 = vmatprep.subr.mxu0 %v44_v1  ;;  %s213_s21 = scalar_lea.vmem %s137_s1, 256  ;;  %p218_p11 = scmp.lt.s32.totalorder %s137_s1, %s137_s1 }
  0x20   :  { %160 = vmatpush3.msra.mxu0 %v44_v1  ;;  %p214_p10 = scmp.ne.s32.totalorder %s137_s1, %s213_s21  ;;  %p219_p12 = scmp.lt.s32.totalorder %s213_s21, %s213_s21 }
  0x21   :  { %161 = vmatprep.subr.mxu0 %v43_v3 }
  0x22   :  { %162 = vmatpush3.msra.mxu0 %v43_v3  ;;  %p220_p13 = por %p219_p12, %p218_p11 }
  0x23   :  { %163 = vmatprep.subr.mxu0 %v42_v4 }
  0x24   :  { %164 = vmatpush3.msra.mxu0 %v42_v4  ;;  %p221_p0 = pnand %p220_p13, %p214_p10 }
  0x25   :  { %166 = vmatmul.mubr.msk.f32.vlgmr.msra.gmra.mxu0 %vm46_vm0, %v41_v5 }
  0xe5   :  { %v167_v6 = vpop.f32.mrf.mxu0 }
  0xe6   :  { %130 = vst.msk [vmem:[#allocation7 + $0x8] sm:$0xff] %vm128_vm1, %v167_v6 }
  0xe7   :  { %v119_v7 = vpop.f32.mrf.mxu0 }
  0xe8   :  { %129 = vst.msk [vmem:[#allocation7] sm:$0xff] %vm128_vm1, %v119_v7 }
  0xe9   :  { %224 = shalt.err (!%p221_p0)
}
  0xea   :  { %142 = dma.vmem_to_hbm [thread:$0]  %s137_s1, 256, %s281_s2, [#allocation4], %s240_s12, %s240_s12, %s241_s13  }
  0xeb   :  { %237 = dma.done.wait [#allocation4], 256  }
  0xec   :  { %238 = vsyncadd [#allocation4], 4294967040 }
  0xed   :  { %146 = vsyncpa [#allocation3], 1 }
  0xee   :  { %147 = vsyncpa [#allocation6], 1 }
  0xef   :  { %148 = vsyncpa [#allocation4], 1 }

</bundles_post_ra>
